<compile_context>
chip_gen: v5e
topology: v5e:2x2
jax: 0.10.0
libtpu: 0.0.40
codegen_flags: <defaults>
</compile_context>

<pallas_src>
import jax
import jax.numpy as jnp
from jax.experimental import pallas as pl
from jax.experimental.pallas import tpu as pltpu


def _round_up(x, m):
    return ((x + m - 1) // m) * m


def _vmem_capacity_bytes():
    try:
        return int(pltpu.get_tpu_info().vmem_capacity_bytes)
    except Exception:
        return 64 * 1024 * 1024  # conservative (v7x per-TC VMEM)


# ----------------------------------------------------------------------------
# Kernel A: fully VMEM-resident weights (small / medium middle_dim).
# ----------------------------------------------------------------------------
def scalingnet_kernel(x_ref, w1_ref, b1_ref, w2_ref, b2_ref, w3_ref, b3_ref,
                      o_ref):
    x = x_ref[...].astype(jnp.bfloat16)          # f32 HBM read, bf16 cast on VPU
    h = jnp.dot(x, w1_ref[...], preferred_element_type=jnp.float32) + b1_ref[...]
    h = jnp.maximum(h, 0.0)
    h = jnp.dot(h.astype(jnp.bfloat16), w2_ref[...],
                preferred_element_type=jnp.float32) + b2_ref[...]
    h = jnp.maximum(h, 0.0)
    h = jnp.dot(h.astype(jnp.bfloat16), w3_ref[...],
                preferred_element_type=jnp.float32) + b3_ref[...]
    # Final ReLU is part of the PyTorch module (act1 applied to linear3 output).
    h = jnp.maximum(h, 0.0)
    o_ref[...] = h.astype(o_ref.dtype)


# ----------------------------------------------------------------------------
# Kernel B: w2 streamed in N-chunks / w3 in matching K-chunks (large middle_dim).
#   out = ReLU( sum_k ReLU(h1 @ w2[:,ck] + b2[ck]) @ w3[ck,:] + b3 )
# ----------------------------------------------------------------------------
def scalingnet_stream_kernel(x_ref, w1_ref, b1_ref, w2_ref, b2_ref, w3_ref,
                             b3_ref, o_ref, h1_ref, acc_ref):
    k = pl.program_id(1)

    @pl.when(k == 0)
    def _():
        x = x_ref[...].astype(jnp.bfloat16)
        h1 = jnp.dot(x, w1_ref[...],
                     preferred_element_type=jnp.float32) + b1_ref[...]
        h1_ref[...] = jnp.maximum(h1, 0.0).astype(h1_ref.dtype)
        acc_ref[...] = jnp.zeros_like(acc_ref)

    h2 = jnp.dot(h1_ref[...], w2_ref[...],
                 preferred_element_type=jnp.float32) + b2_ref[...]
    h2 = jnp.maximum(h2, 0.0)
    acc_ref[...] += jnp.dot(h2.astype(jnp.bfloat16), w3_ref[...],
                            preferred_element_type=jnp.float32)

    @pl.when(k == pl.num_programs(1) - 1)
    def _():
        out = jnp.maximum(acc_ref[...] + b3_ref[...], 0.0)
        o_ref[...] = out.astype(o_ref.dtype)


# ----------------------------------------------------------------------------
# Parameter preparation (done ONCE, outside the per-call wrapper).
# ----------------------------------------------------------------------------
def prepare_params(params):
    """Pad features to lane-dense multiples of 128 and cast weights to bf16."""
    w1, b1 = params["w1"], params["b1"]
    w2, b2 = params["w2"], params["b2"]
    w3, b3 = params["w3"], params["b3"]
    half, mid = w1.shape
    half_p = _round_up(half, 128)
    mid_p = _round_up(mid, 128)

    def pad2(a, rows, cols, dtype):
        return jnp.pad(a, ((0, rows - a.shape[0]),
                           (0, cols - a.shape[1]))).astype(dtype)

    return {
        "w1": pad2(w1, half_p, mid_p, jnp.bfloat16),
        "b1": pad2(b1, 1, mid_p, jnp.float32),
        "w2": pad2(w2, mid_p, mid_p, jnp.bfloat16),
        "b2": pad2(b2, 1, mid_p, jnp.float32),
        "w3": pad2(w3, mid_p, half_p, jnp.bfloat16),
        "b3": pad2(b3, 1, half_p, jnp.float32),
    }


# ----------------------------------------------------------------------------
# Wrapper
# ----------------------------------------------------------------------------
def scaling_net(x, prepped, *, block_batch=512, force_stream=False,
                stream_chunk=512):
    """x: (B, N//2) float32. prepped: output of prepare_params."""
    w1p, b1p = prepped["w1"], prepped["b1"]
    w2p, b2p = prepped["w2"], prepped["b2"]
    w3p, b3p = prepped["w3"], prepped["b3"]
    half_p, mid_p = w1p.shape
    B, half = x.shape

    cap = _vmem_capacity_bytes()
    budget = int(0.75 * cap)

    itm = w1p.dtype.itemsize                      # bf16 -> 2
    w_bytes = (w1p.size + w2p.size + w3p.size) * itm
    b_bytes = (b1p.size + b2p.size + b3p.size) * 4

    def resident_need(tb):
        return (4 * tb * half_p * 4               # x + out tiles, double-buffered f32
                + w_bytes + b_bytes               # single-buffered resident weights
                + tb * mid_p * 10                 # live f32 + bf16 intermediates
                + tb * half_p * 2)                # bf16 copy of x

    # N-chunk size for the streamed path (w2 columns / w3 rows).
    tn = next(c for c in (stream_chunk, 1024, 512, 256, 128)
              if c <= mid_p and mid_p % c == 0)

    def stream_need(tb):
        return (4 * tb * half_p * 4
                + w1p.size * itm + b_bytes        # resident w1 + biases
                + 2 * (mid_p * tn + tn * half_p) * itm + 2 * tn * 4  # streamed chunks
                + tb * mid_p * 2 + tb * half_p * 4                    # h1 / acc scratch
                + tb * mid_p * 4 + tb * tn * 6 + tb * half_p * 2)     # temps

    # ---- batch tiling: minimal padding, >=2 tiles when possible (megacore) ----
    B8 = _round_up(B, 8)
    n_tiles = max(1, -(-B8 // block_batch))
    if n_tiles == 1 and B8 >= 16:
        n_tiles = 2
    TB = _round_up(-(-B8 // n_tiles), 8)

    use_stream = force_stream or resident_need(TB) > budget
    need_fn = stream_need if use_stream else resident_need
    while TB > 8 and need_fn(TB) > budget:
        TB = _round_up(TB // 2, 8)
    n_tiles = -(-B8 // TB)
    B_p = n_tiles * TB

    if (B_p, half_p) != (B, half):
        xp = jnp.pad(x, ((0, B_p - B), (0, half_p - half)))
    else:
        xp = x

    vmem_limit = min(int(0.9 * cap), max(32 * 1024 * 1024, int(1.25 * need_fn(TB))))

    flops = 2 * B_p * (half_p * mid_p + mid_p * mid_p + mid_p * half_p)
    bytes_accessed = xp.size * 4 + w_bytes + b_bytes + B_p * half_p * 4
    cost = pl.CostEstimate(flops=flops, transcendentals=0,
                           bytes_accessed=bytes_accessed)

    def build(pm):
        def spec(shape, index_map, resident=False):
            if resident and pm is not None:
                return pl.BlockSpec(shape, index_map, pipeline_mode=pm)
            return pl.BlockSpec(shape, index_map)

        if not use_stream:
            return pl.pallas_call(
                scalingnet_kernel,
                out_shape=jax.ShapeDtypeStruct((B_p, half_p), x.dtype),
                grid=(n_tiles,),
                in_specs=[
                    spec((TB, half_p), lambda i: (i, 0)),                  # x
                    spec((half_p, mid_p), lambda i: (0, 0), resident=True),  # w1
                    spec((1, mid_p), lambda i: (0, 0), resident=True),       # b1
                    spec((mid_p, mid_p), lambda i: (0, 0), resident=True),   # w2
                    spec((1, mid_p), lambda i: (0, 0), resident=True),       # b2
                    spec((mid_p, half_p), lambda i: (0, 0), resident=True),  # w3
                    spec((1, half_p), lambda i: (0, 0), resident=True),      # b3
                ],
                out_specs=pl.BlockSpec((TB, half_p), lambda i: (i, 0)),
                compiler_params=pltpu.CompilerParams(
                    dimension_semantics=("parallel",),
                    vmem_limit_bytes=vmem_limit),
                cost_estimate=cost,
            )

        nk = mid_p // tn
        return pl.pallas_call(
            scalingnet_stream_kernel,
            out_shape=jax.ShapeDtypeStruct((B_p, half_p), x.dtype),
            grid=(n_tiles, nk),
            in_specs=[
                spec((TB, half_p), lambda i, k: (i, 0)),                     # x
                spec((half_p, mid_p), lambda i, k: (0, 0), resident=True),   # w1
                spec((1, mid_p), lambda i, k: (0, 0), resident=True),        # b1
                spec((mid_p, tn), lambda i, k: (0, k)),                      # w2 (stream)
                spec((1, tn), lambda i, k: (0, k)),                          # b2 (stream)
                spec((tn, half_p), lambda i, k: (k, 0)),                     # w3 (stream)
                spec((1, half_p), lambda i, k: (0, 0), resident=True),       # b3
            ],
            out_specs=pl.BlockSpec((TB, half_p), lambda i, k: (i, 0)),
            scratch_shapes=[pltpu.VMEM((TB, mid_p), jnp.bfloat16),   # h1
                            pltpu.VMEM((TB, half_p), jnp.float32)],  # acc
            compiler_params=pltpu.CompilerParams(
                dimension_semantics=("parallel", "arbitrary"),
                vmem_limit_bytes=vmem_limit),
            cost_estimate=cost,
        )

    try:
        out_padded = build(pl.Buffered(1))(xp, w1p, b1p, w2p, b2p, w3p, b3p)
    except Exception:
        # Fallback if single-buffered residents are rejected by this jax version.
        out_padded = build(None)(xp, w1p, b1p, w2p, b2p, w3p, b3p)

    return out_padded[:B, :half].astype(x.dtype)


def init_params(key, N, middle_dim):
    """nn.Linear-style init (uniform +-1/sqrt(fan_in)); weights stored (in, out)."""
    half = N // 2
    dims = [(half, middle_dim), (middle_dim, middle_dim), (middle_dim, half)]
    params = {}
    for i, (fan_in, fan_out) in enumerate(dims, start=1):
        key, kw, kb = jax.random.split(key, 3)
        bound = 1.0 / jnp.sqrt(jnp.float32(fan_in))
        params[f"w{i}"] = jax.random.uniform(
            kw, (fan_in, fan_out), jnp.float32, -bound, bound)
        params[f"b{i}"] = jax.random.uniform(
            kb, (1, fan_out), jnp.float32, -bound, bound)
    return params


if __name__ == "__main__":
    # ---- references ----
    def ref_bf16(x, p):   # mirrors the kernel's bf16-matmul-input / f32-accum math
        rt = lambda a: a.astype(jnp.bfloat16).astype(jnp.float32)
        h = jnp.maximum(rt(x) @ rt(p["w1"]) + p["b1"], 0.0)
        h = jnp.maximum(rt(h) @ rt(p["w2"]) + p["b2"], 0.0)
        h = jnp.maximum(rt(h) @ rt(p["w3"]) + p["b3"], 0.0)
        return h

    def ref_f32(x, p):    # the "true" PyTorch-f32 forward
        h = jnp.maximum(x @ p["w1"] + p["b1"], 0.0)
        h = jnp.maximum(h @ p["w2"] + p["b2"], 0.0)
        h = jnp.maximum(h @ p["w3"] + p["b3"], 0.0)
        return h

    # ---- test 1: small shapes, resident-weight path ----
    N, middle_dim, batch = 16, 32, 2
    key = jax.random.PRNGKey(0)
    key, kx = jax.random.split(key)
    x = jax.random.normal(kx, (batch, N // 2), dtype=jnp.float32)
    params = init_params(jax.random.PRNGKey(0), N, middle_dim)
    prepped = prepare_params(params)

    out = jax.block_until_ready(scaling_net(x, prepped))
    assert out.shape == (batch, N // 2)
    assert jnp.allclose(out, ref_bf16(x, params), atol=1e-3, rtol=1e-3), (
        jnp.max(jnp.abs(out - ref_bf16(x, params))))
    assert jnp.allclose(out, ref_f32(x, params), atol=2e-2, rtol=2e-2), (
        jnp.max(jnp.abs(out - ref_f32(x, params))))

    # ---- test 2: exercise the streamed w2/w3 path + remainder batch tiling ----
    N2, mid2, batch2 = 16, 256, 260
    key, kx2 = jax.random.split(key)
    x2 = jax.random.normal(kx2, (batch2, N2 // 2), dtype=jnp.float32)
    params2 = init_params(jax.random.PRNGKey(1), N2, mid2)
    prepped2 = prepare_params(params2)

    out2 = jax.block_until_ready(
        scaling_net(x2, prepped2, block_batch=256,
                    force_stream=True, stream_chunk=128))
    assert out2.shape == (batch2, N2 // 2)
    assert jnp.allclose(out2, ref_bf16(x2, params2), atol=1e-3, rtol=1e-3), (
        jnp.max(jnp.abs(out2 - ref_bf16(x2, params2))))

    print("KERNEL_OK")
</pallas_src>

<mosaic_0001>
module attributes {stable_mosaic.version = 11 : i64} {
  func.func @scalingnet_kernel(%arg0: i32, %arg1: memref<8x128xf32, #tpu.memory_space<vmem>>, %arg2: memref<128x128xbf16, #tpu.memory_space<vmem>>, %arg3: memref<1x128xf32, #tpu.memory_space<vmem>>, %arg4: memref<128x128xbf16, #tpu.memory_space<vmem>>, %arg5: memref<1x128xf32, #tpu.memory_space<vmem>>, %arg6: memref<128x128xbf16, #tpu.memory_space<vmem>>, %arg7: memref<1x128xf32, #tpu.memory_space<vmem>>, %arg8: memref<8x128xf32, #tpu.memory_space<vmem>>) attributes {dimension_semantics = [#tpu.dimension_semantics<parallel>], iteration_bounds = array<i64: 1>, scalar_prefetch = 0 : i64, scratch_operands = 0 : i64, tpu.core_type = #tpu.core_type<tc>, window_params = [{transform_indices = @transform_0, window_bounds = array<i64: 8, 128>}, {pipeline_mode = #tpu.pipeline_mode<synchronous>, transform_indices = @transform_1, window_bounds = array<i64: 128, 128>}, {pipeline_mode = #tpu.pipeline_mode<synchronous>, transform_indices = @transform_2, window_bounds = array<i64: 1, 128>}, {pipeline_mode = #tpu.pipeline_mode<synchronous>, transform_indices = @transform_3, window_bounds = array<i64: 128, 128>}, {pipeline_mode = #tpu.pipeline_mode<synchronous>, transform_indices = @transform_4, window_bounds = array<i64: 1, 128>}, {pipeline_mode = #tpu.pipeline_mode<synchronous>, transform_indices = @transform_5, window_bounds = array<i64: 128, 128>}, {pipeline_mode = #tpu.pipeline_mode<synchronous>, transform_indices = @transform_6, window_bounds = array<i64: 1, 128>}, {transform_indices = @transform_7, window_bounds = array<i64: 8, 128>}]} {
    %c0 = arith.constant 0 : index
    %c0_0 = arith.constant 0 : index
    %0 = vector.load %arg1[%c0, %c0_0] : memref<8x128xf32, #tpu.memory_space<vmem>>, vector<8x128xf32>
    %1 = arith.truncf %0 : vector<8x128xf32> to vector<8x128xbf16>
    %c0_1 = arith.constant 0 : index
    %c0_2 = arith.constant 0 : index
    %2 = vector.load %arg2[%c0_1, %c0_2] : memref<128x128xbf16, #tpu.memory_space<vmem>>, vector<128x128xbf16>
    %cst = arith.constant dense<0.000000e+00> : vector<8x128xf32>
    %3 = tpu.matmul %1, %2, %cst {dimension_numbers = #tpu.dot_dimension_numbers<[1], [0], [0], [1], [0, 0, 1, 1], [], []>} : vector<8x128xbf16>, vector<128x128xbf16>, vector<8x128xf32> -> vector<8x128xf32>
    %c0_3 = arith.constant 0 : index
    %c0_4 = arith.constant 0 : index
    %4 = vector.load %arg3[%c0_3, %c0_4] : memref<1x128xf32, #tpu.memory_space<vmem>>, vector<1x128xf32>
    %5 = vector.broadcast %4 : vector<1x128xf32> to vector<8x128xf32>
    %6 = arith.addf %3, %5 : vector<8x128xf32>
    %cst_5 = arith.constant 0.000000e+00 : f32
    %7 = vector.broadcast %cst_5 : f32 to vector<8x128xf32>
    %8 = arith.maximumf %6, %7 : vector<8x128xf32>
    %9 = arith.truncf %8 : vector<8x128xf32> to vector<8x128xbf16>
    %c0_6 = arith.constant 0 : index
    %c0_7 = arith.constant 0 : index
    %10 = vector.load %arg4[%c0_6, %c0_7] : memref<128x128xbf16, #tpu.memory_space<vmem>>, vector<128x128xbf16>
    %cst_8 = arith.constant dense<0.000000e+00> : vector<8x128xf32>
    %11 = tpu.matmul %9, %10, %cst_8 {dimension_numbers = #tpu.dot_dimension_numbers<[1], [0], [0], [1], [0, 0, 1, 1], [], []>} : vector<8x128xbf16>, vector<128x128xbf16>, vector<8x128xf32> -> vector<8x128xf32>
    %c0_9 = arith.constant 0 : index
    %c0_10 = arith.constant 0 : index
    %12 = vector.load %arg5[%c0_9, %c0_10] : memref<1x128xf32, #tpu.memory_space<vmem>>, vector<1x128xf32>
    %13 = vector.broadcast %12 : vector<1x128xf32> to vector<8x128xf32>
    %14 = arith.addf %11, %13 : vector<8x128xf32>
    %cst_11 = arith.constant 0.000000e+00 : f32
    %15 = vector.broadcast %cst_11 : f32 to vector<8x128xf32>
    %16 = arith.maximumf %14, %15 : vector<8x128xf32>
    %17 = arith.truncf %16 : vector<8x128xf32> to vector<8x128xbf16>
    %c0_12 = arith.constant 0 : index
    %c0_13 = arith.constant 0 : index
    %18 = vector.load %arg6[%c0_12, %c0_13] : memref<128x128xbf16, #tpu.memory_space<vmem>>, vector<128x128xbf16>
    %cst_14 = arith.constant dense<0.000000e+00> : vector<8x128xf32>
    %19 = tpu.matmul %17, %18, %cst_14 {dimension_numbers = #tpu.dot_dimension_numbers<[1], [0], [0], [1], [0, 0, 1, 1], [], []>} : vector<8x128xbf16>, vector<128x128xbf16>, vector<8x128xf32> -> vector<8x128xf32>
    %c0_15 = arith.constant 0 : index
    %c0_16 = arith.constant 0 : index
    %20 = vector.load %arg7[%c0_15, %c0_16] : memref<1x128xf32, #tpu.memory_space<vmem>>, vector<1x128xf32>
    %21 = vector.broadcast %20 : vector<1x128xf32> to vector<8x128xf32>
    %22 = arith.addf %19, %21 : vector<8x128xf32>
    %cst_17 = arith.constant 0.000000e+00 : f32
    %23 = vector.broadcast %cst_17 : f32 to vector<8x128xf32>
    %24 = arith.maximumf %22, %23 : vector<8x128xf32>
    %c0_18 = arith.constant 0 : index
    %c0_19 = arith.constant 0 : index
    %25 = vector.load %arg8[%c0_18, %c0_19] : memref<8x128xf32, #tpu.memory_space<vmem>>, vector<8x128xf32>
    tpu.vector_store %arg8[%c0_18, %c0_19], %24 {strides = array<i32>} : memref<8x128xf32, #tpu.memory_space<vmem>>, vector<8x128xf32>,
    return
  }
  func.func @transform_0(%arg0: i32) -> (i32, i32) {
    %c0_i32 = arith.constant 0 : i32
    %c0_i32_0 = arith.constant 0 : i32
    return %arg0, %c0_i32 : i32, i32
  }
  func.func @transform_1(%arg0: i32) -> (i32, i32) {
    %c0_i32 = arith.constant 0 : i32
    %c0_i32_0 = arith.constant 0 : i32
    %c0_i32_1 = arith.constant 0 : i32
    return %c0_i32, %c0_i32_0 : i32, i32
  }
  func.func @transform_2(%arg0: i32) -> (i32, i32) {
    %c0_i32 = arith.constant 0 : i32
    %c0_i32_0 = arith.constant 0 : i32
    %c0_i32_1 = arith.constant 0 : i32
    return %c0_i32, %c0_i32_0 : i32, i32
  }
  func.func @transform_3(%arg0: i32) -> (i32, i32) {
    %c0_i32 = arith.constant 0 : i32
    %c0_i32_0 = arith.constant 0 : i32
    %c0_i32_1 = arith.constant 0 : i32
    return %c0_i32, %c0_i32_0 : i32, i32
  }
  func.func @transform_4(%arg0: i32) -> (i32, i32) {
    %c0_i32 = arith.constant 0 : i32
    %c0_i32_0 = arith.constant 0 : i32
    %c0_i32_1 = arith.constant 0 : i32
    return %c0_i32, %c0_i32_0 : i32, i32
  }
  func.func @transform_5(%arg0: i32) -> (i32, i32) {
    %c0_i32 = arith.constant 0 : i32
    %c0_i32_0 = arith.constant 0 : i32
    %c0_i32_1 = arith.constant 0 : i32
    return %c0_i32, %c0_i32_0 : i32, i32
  }
  func.func @transform_6(%arg0: i32) -> (i32, i32) {
    %c0_i32 = arith.constant 0 : i32
    %c0_i32_0 = arith.constant 0 : i32
    %c0_i32_1 = arith.constant 0 : i32
    return %c0_i32, %c0_i32_0 : i32, i32
  }
  func.func @transform_7(%arg0: i32) -> (i32, i32) {
    %c0_i32 = arith.constant 0 : i32
    %c0_i32_0 = arith.constant 0 : i32
    return %arg0, %c0_i32 : i32, i32
  }
}

module attributes {stable_mosaic.version = 11 : i64} {
  func.func @scalingnet_kernel(%arg0: i32, %arg1: memref<8x128xf32, #tpu.memory_space<vmem>>, %arg2: memref<128x128xbf16, #tpu.memory_space<vmem>>, %arg3: memref<1x128xf32, #tpu.memory_space<vmem>>, %arg4: memref<128x128xbf16, #tpu.memory_space<vmem>>, %arg5: memref<1x128xf32, #tpu.memory_space<vmem>>, %arg6: memref<128x128xbf16, #tpu.memory_space<vmem>>, %arg7: memref<1x128xf32, #tpu.memory_space<vmem>>, %arg8: memref<8x128xf32, #tpu.memory_space<vmem>>) attributes {dimension_semantics = [#tpu.dimension_semantics<parallel>], iteration_bounds = array<i64: 1>, scalar_prefetch = 0 : i64, scratch_operands = 0 : i64, tpu.core_type = #tpu.core_type<tc>, window_params = [{transform_indices = @transform_0, window_bounds = array<i64: 8, 128>}, {pipeline_mode = #tpu.pipeline_mode<synchronous>, transform_indices = @transform_1, window_bounds = array<i64: 128, 128>}, {pipeline_mode = #tpu.pipeline_mode<synchronous>, transform_indices = @transform_2, window_bounds = array<i64: 1, 128>}, {pipeline_mode = #tpu.pipeline_mode<synchronous>, transform_indices = @transform_3, window_bounds = array<i64: 128, 128>}, {pipeline_mode = #tpu.pipeline_mode<synchronous>, transform_indices = @transform_4, window_bounds = array<i64: 1, 128>}, {pipeline_mode = #tpu.pipeline_mode<synchronous>, transform_indices = @transform_5, window_bounds = array<i64: 128, 128>}, {pipeline_mode = #tpu.pipeline_mode<synchronous>, transform_indices = @transform_6, window_bounds = array<i64: 1, 128>}, {transform_indices = @transform_7, window_bounds = array<i64: 8, 128>}]} {
    %c0 = arith.constant 0 : index
    %c0_0 = arith.constant 0 : index
    %0 = vector.load %arg1[%c0, %c0_0] : memref<8x128xf32, #tpu.memory_space<vmem>>, vector<8x128xf32>
    %1 = arith.truncf %0 : vector<8x128xf32> to vector<8x128xbf16>
    %c0_1 = arith.constant 0 : index
    %c0_2 = arith.constant 0 : index
    %2 = vector.load %arg2[%c0_1, %c0_2] : memref<128x128xbf16, #tpu.memory_space<vmem>>, vector<128x128xbf16>
    %cst = arith.constant dense<0.000000e+00> : vector<8x128xf32>
    %3 = tpu.matmul %1, %2, %cst {dimension_numbers = #tpu.dot_dimension_numbers<[1], [0], [0], [1], [0, 0, 1, 1], [], []>} : vector<8x128xbf16>, vector<128x128xbf16>, vector<8x128xf32> -> vector<8x128xf32>
    %c0_3 = arith.constant 0 : index
    %c0_4 = arith.constant 0 : index
    %4 = vector.load %arg3[%c0_3, %c0_4] : memref<1x128xf32, #tpu.memory_space<vmem>>, vector<1x128xf32>
    %5 = vector.broadcast %4 : vector<1x128xf32> to vector<8x128xf32>
    %6 = arith.addf %3, %5 : vector<8x128xf32>
    %cst_5 = arith.constant 0.000000e+00 : f32
    %7 = vector.broadcast %cst_5 : f32 to vector<8x128xf32>
    %8 = arith.maximumf %6, %7 : vector<8x128xf32>
    %9 = arith.truncf %8 : vector<8x128xf32> to vector<8x128xbf16>
    %c0_6 = arith.constant 0 : index
    %c0_7 = arith.constant 0 : index
    %10 = vector.load %arg4[%c0_6, %c0_7] : memref<128x128xbf16, #tpu.memory_space<vmem>>, vector<128x128xbf16>
    %cst_8 = arith.constant dense<0.000000e+00> : vector<8x128xf32>
    %11 = tpu.matmul %9, %10, %cst_8 {dimension_numbers = #tpu.dot_dimension_numbers<[1], [0], [0], [1], [0, 0, 1, 1], [], []>} : vector<8x128xbf16>, vector<128x128xbf16>, vector<8x128xf32> -> vector<8x128xf32>
    %c0_9 = arith.constant 0 : index
    %c0_10 = arith.constant 0 : index
    %12 = vector.load %arg5[%c0_9, %c0_10] : memref<1x128xf32, #tpu.memory_space<vmem>>, vector<1x128xf32>
    %13 = vector.broadcast %12 : vector<1x128xf32> to vector<8x128xf32>
    %14 = arith.addf %11, %13 : vector<8x128xf32>
    %cst_11 = arith.constant 0.000000e+00 : f32
    %15 = vector.broadcast %cst_11 : f32 to vector<8x128xf32>
    %16 = arith.maximumf %14, %15 : vector<8x128xf32>
    %17 = arith.truncf %16 : vector<8x128xf32> to vector<8x128xbf16>
    %c0_12 = arith.constant 0 : index
    %c0_13 = arith.constant 0 : index
    %18 = vector.load %arg6[%c0_12, %c0_13] : memref<128x128xbf16, #tpu.memory_space<vmem>>, vector<128x128xbf16>
    %cst_14 = arith.constant dense<0.000000e+00> : vector<8x128xf32>
    %19 = tpu.matmul %17, %18, %cst_14 {dimension_numbers = #tpu.dot_dimension_numbers<[1], [0], [0], [1], [0, 0, 1, 1], [], []>} : vector<8x128xbf16>, vector<128x128xbf16>, vector<8x128xf32> -> vector<8x128xf32>
    %c0_15 = arith.constant 0 : index
    %c0_16 = arith.constant 0 : index
    %20 = vector.load %arg7[%c0_15, %c0_16] : memref<1x128xf32, #tpu.memory_space<vmem>>, vector<1x128xf32>
    %21 = vector.broadcast %20 : vector<1x128xf32> to vector<8x128xf32>
    %22 = arith.addf %19, %21 : vector<8x128xf32>
    %cst_17 = arith.constant 0.000000e+00 : f32
    %23 = vector.broadcast %cst_17 : f32 to vector<8x128xf32>
    %24 = arith.maximumf %22, %23 : vector<8x128xf32>
    %c0_18 = arith.constant 0 : index
    %c0_19 = arith.constant 0 : index
    %25 = vector.load %arg8[%c0_18, %c0_19] : memref<8x128xf32, #tpu.memory_space<vmem>>, vector<8x128xf32>
    tpu.vector_store %arg8[%c0_18, %c0_19], %24 {strides = array<i32>} : memref<8x128xf32, #tpu.memory_space<vmem>>, vector<8x128xf32>,
    return
  }
  func.func @transform_0(%arg0: i32) -> (i32, i32) {
    %c0_i32 = arith.constant 0 : i32
    %c0_i32_0 = arith.constant 0 : i32
    return %arg0, %c0_i32 : i32, i32
  }
  func.func @transform_1(%arg0: i32) -> (i32, i32) {
    %c0_i32 = arith.constant 0 : i32
    %c0_i32_0 = arith.constant 0 : i32
    %c0_i32_1 = arith.constant 0 : i32
    return %c0_i32, %c0_i32_0 : i32, i32
  }
  func.func @transform_2(%arg0: i32) -> (i32, i32) {
    %c0_i32 = arith.constant 0 : i32
    %c0_i32_0 = arith.constant 0 : i32
    %c0_i32_1 = arith.constant 0 : i32
    return %c0_i32, %c0_i32_0 : i32, i32
  }
  func.func @transform_3(%arg0: i32) -> (i32, i32) {
    %c0_i32 = arith.constant 0 : i32
    %c0_i32_0 = arith.constant 0 : i32
    %c0_i32_1 = arith.constant 0 : i32
    return %c0_i32, %c0_i32_0 : i32, i32
  }
  func.func @transform_4(%arg0: i32) -> (i32, i32) {
    %c0_i32 = arith.constant 0 : i32
    %c0_i32_0 = arith.constant 0 : i32
    %c0_i32_1 = arith.constant 0 : i32
    return %c0_i32, %c0_i32_0 : i32, i32
  }
  func.func @transform_5(%arg0: i32) -> (i32, i32) {
    %c0_i32 = arith.constant 0 : i32
    %c0_i32_0 = arith.constant 0 : i32
    %c0_i32_1 = arith.constant 0 : i32
    return %c0_i32, %c0_i32_0 : i32, i32
  }
  func.func @transform_6(%arg0: i32) -> (i32, i32) {
    %c0_i32 = arith.constant 0 : i32
    %c0_i32_0 = arith.constant 0 : i32
    %c0_i32_1 = arith.constant 0 : i32
    return %c0_i32, %c0_i32_0 : i32, i32
  }
  func.func @transform_7(%arg0: i32) -> (i32, i32) {
    %c0_i32 = arith.constant 0 : i32
    %c0_i32_0 = arith.constant 0 : i32
    return %arg0, %c0_i32 : i32, i32
  }
}

</mosaic_0001>

<bundles_post_ra>
// kernel: tpu_custom_call.1
= control target key start
LH: loop header
LB: loop body
LE: loop exit
PB: predicated region body
PF: predicated region fallthrough
CT: control target
= control target key end

     0   :  { %12 = vsyncpa [#allocation3], 0  ;;  %s687_s0 = inlined_call_operand.hbm [shape: f32[8,128], index: 0, kind: input, shape index: {}]   ;;  %s688_s1 = inlined_call_operand.hbm [shape: bf16[128,128], index: 1, kind: input, shape index: {}]   ;;  %s689_s2 = inlined_call_operand.vmem [shape: f32[1,128], index: 2, kind: input, shape index: {}]   ;;  %s690_s3 = inlined_call_operand.hbm [shape: bf16[128,128], index: 3, kind: input, shape index: {}]   ;;  %s691_s4 = inlined_call_operand.vmem [shape: f32[1,128], index: 4, kind: input, shape index: {}]   ;;  %s692_s5 = inlined_call_operand.hbm [shape: bf16[128,128], index: 5, kind: input, shape index: {}]   ;;  %s693_s6 = inlined_call_operand.vmem [shape: f32[1,128], index: 6, kind: input, shape index: {}]   ;;  %s694_s7 = inlined_call_operand.hbm [shape: f32[8,128], index: 7, kind: output, shape index: {}]  }
   0x1   :  { %13 = vsyncpa [#allocation6], 0 }
   0x2   :  { %14 = vsyncpa [#allocation9], 0  ;;  %s31_s26 = sshll.u32 %s688_s1, 4  ;;  %s32_s26 = int_to_ptr.hbm [resolvable:$true] %s31_s26 }
   0x3   :  { %15 = vsyncpa [#allocation4], 0  ;;  %s616_s27 = smov [#allocation5]   ;;  %s21_s8 = sshll.u32 %s687_s0, 4  ;;  %s22_s8 = int_to_ptr.hbm [resolvable:$true] %s21_s8 }
   0x4   :  { %s33_s28 = sshll.u32 %s616_s27, 4  ;;  %s617_s9 = smov 64   ;;  %s34_s28 = int_to_ptr.vmem [resolvable:$true] %s33_s28 }
   0x5   :  { %s618_s10 = smov 4   ;;  %s619_s11 = smov [#allocation2]  }
   0x6   :  { %39 = dma.hbm_to_vmem [thread:$0]  %s32_s26, 1024, %s34_s28, [#allocation6], %s617_s9, %s617_s9, %s618_s10  }
   0x7   :  { %s23_s12 = sshll.u32 %s619_s11, 4  ;;  %s46_s15 = sshll.u32 %s690_s3, 4  ;;  %s24_s12 = int_to_ptr.vmem [resolvable:$true] %s23_s12  ;;  %s47_s15 = int_to_ptr.hbm [resolvable:$true] %s46_s15 }
   0x8   :  { %26 = dma.hbm_to_vmem [thread:$0]  %s22_s8, 128, %s24_s12, [#allocation3]  }
   0x9   :  { %s61_s17 = sshll.u32 %s692_s5, 4  ;;  %s620_s18 = smov [#allocation7]   ;;  %s62_s17 = int_to_ptr.hbm [resolvable:$true] %s61_s17 }
   0xa   :  { %s48_s19 = sshll.u32 %s620_s18, 4  ;;  %s621_s0 = smov [#allocation8]   ;;  %s49_s19 = int_to_ptr.vmem [resolvable:$true] %s48_s19 }
   0xb   :  { %54 = dma.hbm_to_vmem [thread:$0]  %s47_s15, 1024, %s49_s19, [#allocation6], %s617_s9, %s617_s9, %s618_s10  }
   0xc   :  { %s63_s20 = sshll.u32 %s621_s0, 4  ;;  %s64_s20 = int_to_ptr.vmem [resolvable:$true] %s63_s20 }
   0xd   :  { %69 = dma.hbm_to_vmem [thread:$0]  %s62_s17, 1024, %s64_s20, [#allocation9], %s617_s9, %s617_s9, %s618_s10  }
   0xe   :  { %608 = dma.done.wait [#allocation3], 128  }
   0xf   :  { %609 = vsyncadd [#allocation3], 4294967168 }
  0x10   :  { %610 = dma.done.wait [#allocation6], 2048  }
  0x11   :  { %611 = vsyncadd [#allocation6], 4294965248 }
  0x12   :  { %612 = dma.done.wait [#allocation9], 1024  }
  0x13   :  { %613 = vsyncadd [#allocation9], 4294966272  ;;  %v461_v0 = vld [vmem:[#allocation5 + $0x38] sm:$0xff]  ;;  %v460_v1 = vld [vmem:[#allocation5 + $0x30] sm:$0xff]  ;;  %s622_s24 = smov [#allocation10]   ;;  %s346_s28 = sshll.u32 %s694_s7, 4  ;;  %s347_s28 = int_to_ptr.hbm [resolvable:$true] %s346_s28 }
  0x14   :  { %158 = vmatpush.bf16.msra.mxu0 %v461_v0  ;;  %v469_v2 = vld [vmem:[#allocation7 + $0x38] sm:$0xff]  ;;  %v468_v3 = vld [vmem:[#allocation7 + $0x30] sm:$0xff]  ;;  %v459_v4 = vld [vmem:[#allocation5 + $0x28] sm:$0xff]  ;;  %s344_s25 = sshll.u32 %s622_s24, 4  ;;  %s345_s25 = int_to_ptr.vmem [resolvable:$true] %s344_s25 }
  0x15   :  { %241 = vmatpush.bf16.msra.mxu1 %v469_v2  ;;  %v467_v5 = vld [vmem:[#allocation7 + $0x28] sm:$0xff]  ;;  %v458_v6 = vld [vmem:[#allocation5 + $0x20] sm:$0xff]  ;;  %v457_v8 = vld [vmem:[#allocation5 + $0x18] sm:$0xff] }
  0x16   :  { %v466_v7 = vld [vmem:[#allocation7 + $0x20] sm:$0xff]  ;;  %v465_v9 = vld [vmem:[#allocation7 + $0x18] sm:$0xff]  ;;  %v456_v10 = vld [vmem:[#allocation5 + $0x10] sm:$0xff] }
  0x17   :  { %v464_v11 = vld [vmem:[#allocation7 + $0x10] sm:$0xff]  ;;  %v455_v12 = vld [vmem:[#allocation5 + $0x8] sm:$0xff]  ;;  %v454_v13 = vld [vmem:[#allocation5] sm:$0xff] }
  0x18   :  { %159 = vmatpush.bf16.msra.mxu0 %v460_v1  ;;  %v88_v14 = vld [vmem:[#allocation2] sm:$0xff]  ;;  %v463_v16 = vld [vmem:[#allocation7 + $0x8] sm:$0xff]  ;;  %v462_v17 = vld [vmem:[#allocation7] sm:$0xff] }
  0x19   :  { %242 = vmatpush.bf16.msra.mxu1 %v468_v3  ;;  %v89_v15 = vpack.c.bf16 %v88_v14, %v88_v14  ;;  %v477_v18 = vld [vmem:[#allocation8 + $0x38] sm:$0xff]  ;;  %v476_v19 = vld [vmem:[#allocation8 + $0x30] sm:$0xff]  ;;  %v475_v20 = vld [vmem:[#allocation8 + $0x28] sm:$0xff] }
  0x1a   :  { %324 = vmatpush.bf16.msra.mxu2 %v477_v18  ;;  %v474_v21 = vld [vmem:[#allocation8 + $0x20] sm:$0xff]  ;;  %v473_v22 = vld [vmem:[#allocation8 + $0x18] sm:$0xff]  ;;  %v472_v23 = vld [vmem:[#allocation8 + $0x10] sm:$0xff] }
  0x1b   :  { %v485_v24 = vld [vmem:[%s689_s2] ss:$0 sm:$0xff]  ;;  %v471_v30 = vld [vmem:[#allocation8 + $0x8] sm:$0xff]  ;;  %v470_v31 = vld [vmem:[#allocation8] sm:$0xff] }
  0x1c   :  { %160 = vmatpush.bf16.msra.mxu0 %v459_v4  ;;  %v486_v32 = vld [vmem:[%s691_s4] ss:$0 sm:$0xff] }
  0x1d   :  { %243 = vmatpush.bf16.msra.mxu1 %v467_v5  ;;  %v487_v38 = vld [vmem:[%s693_s6] ss:$0 sm:$0xff] }
  0x1e   :  { %325 = vmatpush.bf16.msra.mxu2 %v476_v19 }
  0x20   :  { %161 = vmatpush.bf16.msra.mxu0 %v458_v6 }
  0x21   :  { %244 = vmatpush.bf16.msra.mxu1 %v466_v7 }
  0x22   :  { %326 = vmatpush.bf16.msra.mxu2 %v475_v20 }
  0x24   :  { %162 = vmatpush.bf16.msra.mxu0 %v457_v8 }
  0x25   :  { %245 = vmatpush.bf16.msra.mxu1 %v465_v9 }
  0x26   :  { %327 = vmatpush.bf16.msra.mxu2 %v474_v21 }
  0x28   :  { %163 = vmatpush.bf16.msra.mxu0 %v456_v10 }
  0x29   :  { %246 = vmatpush.bf16.msra.mxu1 %v464_v11 }
  0x2a   :  { %328 = vmatpush.bf16.msra.mxu2 %v473_v22 }
  0x2c   :  { %164 = vmatpush.bf16.msra.mxu0 %v455_v12 }
  0x2d   :  { %247 = vmatpush.bf16.msra.mxu1 %v463_v16 }
  0x2e   :  { %329 = vmatpush.bf16.msra.mxu2 %v472_v23 }
  0x30   :  { %165 = vmatpush.bf16.msra.mxu0 %v454_v13 }
  0x31   :  { %248 = vmatpush.bf16.msra.mxu1 %v462_v17 }
  0x32   :  { %330 = vmatpush.bf16.msra.mxu2 %v471_v30 }
  0x33   :  { %166 = vmatmul.bf16.vlgmr.msra.gmra.mxu0 %v89_v15 }
  0x36   :  { %331 = vmatpush.bf16.msra.mxu2 %v470_v31 }
  0xb0   :  { %v167_v25 = vpop.f32.mrf.mxu0 }
  0xb1   :  { %v168_v26 = vadd.f32 %v485_v24, %v167_v25 }
  0xb3   :  { %v171_v27 = vmax.f32 %v168_v26, 0.0 }
  0xb5   :  { %v172_v28 = vpack.c.bf16 %v171_v27, %v171_v27 }
  0xb7   :  { %249 = vmatmul.bf16.vlgmr.msra.gmra.mxu1 %v172_v28 }
  0xb8   :  { %v169_v29 = vpop.f32.mrf.mxu0 }
 0x134   :  { %v250_v33 = vpop.f32.mrf.mxu1 }
 0x135   :  { %v251_v34 = vadd.f32 %v486_v32, %v250_v33 }
 0x137   :  { %v254_v35 = vmax.f32 %v251_v34, 0.0 }
 0x139   :  { %v255_v36 = vpack.c.bf16 %v254_v35, %v254_v35 }
 0x13b   :  { %332 = vmatmul.bf16.vlgmr.msra.gmra.mxu2 %v255_v36 }
 0x13c   :  { %v252_v37 = vpop.f32.mrf.mxu1 }
 0x1be   :  { %v333_v39 = vpop.f32.mrf.mxu2 }
 0x1bf   :  { %v334_v40 = vadd.f32 %v487_v38, %v333_v39 }
 0x1c1   :  { %v337_v41 = vmax.f32 %v334_v40, 0.0 }
 0x1c3   :  { %338 = vst [vmem:[#allocation10] sm:$0xff] %v337_v41 }
 0x1c4   :  { %349 = dma.vmem_to_hbm [thread:$0]  %s345_s25, 128, %s347_s28, [#allocation4]  }
 0x1c6   :  { %v335_v42 = vpop.f32.mrf.mxu2 }
 0x1c7   :  { %614 = dma.done.wait [#allocation4], 128  }
 0x1c8   :  { %615 = vsyncadd [#allocation4], 4294967168 }
 0x1c9   :  { %354 = vsyncpa [#allocation3], 1 }
 0x1ca   :  { %355 = vsyncpa [#allocation6], 1 }
 0x1cb   :  { %356 = vsyncpa [#allocation9], 1 }
 0x1cc   :  { %357 = vsyncpa [#allocation4], 1 }

// kernel: tpu_custom_call.1
= control target key start
LH: loop header
LB: loop body
LE: loop exit
PB: predicated region body
PF: predicated region fallthrough
CT: control target
= control target key end

     0   :  { %12 = vsyncpa [#allocation3], 0  ;;  %s687_s0 = inlined_call_operand.hbm [shape: f32[8,128], index: 0, kind: input, shape index: {}]   ;;  %s688_s1 = inlined_call_operand.hbm [shape: bf16[128,128], index: 1, kind: input, shape index: {}]   ;;  %s689_s2 = inlined_call_operand.vmem [shape: f32[1,128], index: 2, kind: input, shape index: {}]   ;;  %s690_s3 = inlined_call_operand.hbm [shape: bf16[128,128], index: 3, kind: input, shape index: {}]   ;;  %s691_s4 = inlined_call_operand.vmem [shape: f32[1,128], index: 4, kind: input, shape index: {}]   ;;  %s692_s5 = inlined_call_operand.hbm [shape: bf16[128,128], index: 5, kind: input, shape index: {}]   ;;  %s693_s6 = inlined_call_operand.vmem [shape: f32[1,128], index: 6, kind: input, shape index: {}]   ;;  %s694_s7 = inlined_call_operand.hbm [shape: f32[8,128], index: 7, kind: output, shape index: {}]  }
   0x1   :  { %13 = vsyncpa [#allocation6], 0 }
   0x2   :  { %14 = vsyncpa [#allocation9], 0  ;;  %s31_s26 = sshll.u32 %s688_s1, 4  ;;  %s32_s26 = int_to_ptr.hbm [resolvable:$true] %s31_s26 }
   0x3   :  { %15 = vsyncpa [#allocation4], 0  ;;  %s616_s27 = smov [#allocation5]   ;;  %s21_s8 = sshll.u32 %s687_s0, 4  ;;  %s22_s8 = int_to_ptr.hbm [resolvable:$true] %s21_s8 }
   0x4   :  { %s33_s28 = sshll.u32 %s616_s27, 4  ;;  %s617_s9 = smov 64   ;;  %s34_s28 = int_to_ptr.vmem [resolvable:$true] %s33_s28 }
   0x5   :  { %s618_s10 = smov 4   ;;  %s619_s11 = smov [#allocation2]  }
   0x6   :  { %39 = dma.hbm_to_vmem [thread:$0]  %s32_s26, 1024, %s34_s28, [#allocation6], %s617_s9, %s617_s9, %s618_s10  }
   0x7   :  { %s23_s12 = sshll.u32 %s619_s11, 4  ;;  %s46_s15 = sshll.u32 %s690_s3, 4  ;;  %s24_s12 = int_to_ptr.vmem [resolvable:$true] %s23_s12  ;;  %s47_s15 = int_to_ptr.hbm [resolvable:$true] %s46_s15 }
   0x8   :  { %26 = dma.hbm_to_vmem [thread:$0]  %s22_s8, 128, %s24_s12, [#allocation3]  }
   0x9   :  { %s61_s17 = sshll.u32 %s692_s5, 4  ;;  %s620_s18 = smov [#allocation7]   ;;  %s62_s17 = int_to_ptr.hbm [resolvable:$true] %s61_s17 }
   0xa   :  { %s48_s19 = sshll.u32 %s620_s18, 4  ;;  %s621_s0 = smov [#allocation8]   ;;  %s49_s19 = int_to_ptr.vmem [resolvable:$true] %s48_s19 }
   0xb   :  { %54 = dma.hbm_to_vmem [thread:$0]  %s47_s15, 1024, %s49_s19, [#allocation6], %s617_s9, %s617_s9, %s618_s10  }
   0xc   :  { %s63_s20 = sshll.u32 %s621_s0, 4  ;;  %s64_s20 = int_to_ptr.vmem [resolvable:$true] %s63_s20 }
   0xd   :  { %69 = dma.hbm_to_vmem [thread:$0]  %s62_s17, 1024, %s64_s20, [#allocation9], %s617_s9, %s617_s9, %s618_s10  }
   0xe   :  { %608 = dma.done.wait [#allocation3], 128  }
   0xf   :  { %609 = vsyncadd [#allocation3], 4294967168 }
  0x10   :  { %610 = dma.done.wait [#allocation6], 2048  }
  0x11   :  { %611 = vsyncadd [#allocation6], 4294965248 }
  0x12   :  { %612 = dma.done.wait [#allocation9], 1024  }
  0x13   :  { %613 = vsyncadd [#allocation9], 4294966272  ;;  %v461_v0 = vld [vmem:[#allocation5 + $0x38] sm:$0xff]  ;;  %v460_v1 = vld [vmem:[#allocation5 + $0x30] sm:$0xff]  ;;  %s622_s24 = smov [#allocation10]   ;;  %s346_s28 = sshll.u32 %s694_s7, 4  ;;  %s347_s28 = int_to_ptr.hbm [resolvable:$true] %s346_s28 }
  0x14   :  { %158 = vmatpush.bf16.msra.mxu0 %v461_v0  ;;  %v469_v2 = vld [vmem:[#allocation7 + $0x38] sm:$0xff]  ;;  %v468_v3 = vld [vmem:[#allocation7 + $0x30] sm:$0xff]  ;;  %v459_v4 = vld [vmem:[#allocation5 + $0x28] sm:$0xff]  ;;  %s344_s25 = sshll.u32 %s622_s24, 4  ;;  %s345_s25 = int_to_ptr.vmem [resolvable:$true] %s344_s25 }
  0x15   :  { %241 = vmatpush.bf16.msra.mxu1 %v469_v2  ;;  %v467_v5 = vld [vmem:[#allocation7 + $0x28] sm:$0xff]  ;;  %v458_v6 = vld [vmem:[#allocation5 + $0x20] sm:$0xff]  ;;  %v457_v8 = vld [vmem:[#allocation5 + $0x18] sm:$0xff] }
  0x16   :  { %v466_v7 = vld [vmem:[#allocation7 + $0x20] sm:$0xff]  ;;  %v465_v9 = vld [vmem:[#allocation7 + $0x18] sm:$0xff]  ;;  %v456_v10 = vld [vmem:[#allocation5 + $0x10] sm:$0xff] }
  0x17   :  { %v464_v11 = vld [vmem:[#allocation7 + $0x10] sm:$0xff]  ;;  %v455_v12 = vld [vmem:[#allocation5 + $0x8] sm:$0xff]  ;;  %v454_v13 = vld [vmem:[#allocation5] sm:$0xff] }
  0x18   :  { %159 = vmatpush.bf16.msra.mxu0 %v460_v1  ;;  %v88_v14 = vld [vmem:[#allocation2] sm:$0xff]  ;;  %v463_v16 = vld [vmem:[#allocation7 + $0x8] sm:$0xff]  ;;  %v462_v17 = vld [vmem:[#allocation7] sm:$0xff] }
  0x19   :  { %242 = vmatpush.bf16.msra.mxu1 %v468_v3  ;;  %v89_v15 = vpack.c.bf16 %v88_v14, %v88_v14  ;;  %v477_v18 = vld [vmem:[#allocation8 + $0x38] sm:$0xff]  ;;  %v476_v19 = vld [vmem:[#allocation8 + $0x30] sm:$0xff]  ;;  %v475_v20 = vld [vmem:[#allocation8 + $0x28] sm:$0xff] }
  0x1a   :  { %324 = vmatpush.bf16.msra.mxu2 %v477_v18  ;;  %v474_v21 = vld [vmem:[#allocation8 + $0x20] sm:$0xff]  ;;  %v473_v22 = vld [vmem:[#allocation8 + $0x18] sm:$0xff]  ;;  %v472_v23 = vld [vmem:[#allocation8 + $0x10] sm:$0xff] }
  0x1b   :  { %v485_v24 = vld [vmem:[%s689_s2] ss:$0 sm:$0xff]  ;;  %v471_v30 = vld [vmem:[#allocation8 + $0x8] sm:$0xff]  ;;  %v470_v31 = vld [vmem:[#allocation8] sm:$0xff] }
  0x1c   :  { %160 = vmatpush.bf16.msra.mxu0 %v459_v4  ;;  %v486_v32 = vld [vmem:[%s691_s4] ss:$0 sm:$0xff] }
  0x1d   :  { %243 = vmatpush.bf16.msra.mxu1 %v467_v5  ;;  %v487_v38 = vld [vmem:[%s693_s6] ss:$0 sm:$0xff] }
  0x1e   :  { %325 = vmatpush.bf16.msra.mxu2 %v476_v19 }
  0x20   :  { %161 = vmatpush.bf16.msra.mxu0 %v458_v6 }
  0x21   :  { %244 = vmatpush.bf16.msra.mxu1 %v466_v7 }
  0x22   :  { %326 = vmatpush.bf16.msra.mxu2 %v475_v20 }
  0x24   :  { %162 = vmatpush.bf16.msra.mxu0 %v457_v8 }
  0x25   :  { %245 = vmatpush.bf16.msra.mxu1 %v465_v9 }
  0x26   :  { %327 = vmatpush.bf16.msra.mxu2 %v474_v21 }
  0x28   :  { %163 = vmatpush.bf16.msra.mxu0 %v456_v10 }
  0x29   :  { %246 = vmatpush.bf16.msra.mxu1 %v464_v11 }
  0x2a   :  { %328 = vmatpush.bf16.msra.mxu2 %v473_v22 }
  0x2c   :  { %164 = vmatpush.bf16.msra.mxu0 %v455_v12 }
  0x2d   :  { %247 = vmatpush.bf16.msra.mxu1 %v463_v16 }
  0x2e   :  { %329 = vmatpush.bf16.msra.mxu2 %v472_v23 }
  0x30   :  { %165 = vmatpush.bf16.msra.mxu0 %v454_v13 }
  0x31   :  { %248 = vmatpush.bf16.msra.mxu1 %v462_v17 }
  0x32   :  { %330 = vmatpush.bf16.msra.mxu2 %v471_v30 }
  0x33   :  { %166 = vmatmul.bf16.vlgmr.msra.gmra.mxu0 %v89_v15 }
  0x36   :  { %331 = vmatpush.bf16.msra.mxu2 %v470_v31 }
  0xb0   :  { %v167_v25 = vpop.f32.mrf.mxu0 }
  0xb1   :  { %v168_v26 = vadd.f32 %v485_v24, %v167_v25 }
  0xb3   :  { %v171_v27 = vmax.f32 %v168_v26, 0.0 }
  0xb5   :  { %v172_v28 = vpack.c.bf16 %v171_v27, %v171_v27 }
  0xb7   :  { %249 = vmatmul.bf16.vlgmr.msra.gmra.mxu1 %v172_v28 }
  0xb8   :  { %v169_v29 = vpop.f32.mrf.mxu0 }
 0x134   :  { %v250_v33 = vpop.f32.mrf.mxu1 }
 0x135   :  { %v251_v34 = vadd.f32 %v486_v32, %v250_v33 }
 0x137   :  { %v254_v35 = vmax.f32 %v251_v34, 0.0 }
 0x139   :  { %v255_v36 = vpack.c.bf16 %v254_v35, %v254_v35 }
 0x13b   :  { %332 = vmatmul.bf16.vlgmr.msra.gmra.mxu2 %v255_v36 }
 0x13c   :  { %v252_v37 = vpop.f32.mrf.mxu1 }
 0x1be   :  { %v333_v39 = vpop.f32.mrf.mxu2 }
 0x1bf   :  { %v334_v40 = vadd.f32 %v487_v38, %v333_v39 }
 0x1c1   :  { %v337_v41 = vmax.f32 %v334_v40, 0.0 }
 0x1c3   :  { %338 = vst [vmem:[#allocation10] sm:$0xff] %v337_v41 }
 0x1c4   :  { %349 = dma.vmem_to_hbm [thread:$0]  %s345_s25, 128, %s347_s28, [#allocation4]  }
 0x1c6   :  { %v335_v42 = vpop.f32.mrf.mxu2 }
 0x1c7   :  { %614 = dma.done.wait [#allocation4], 128  }
 0x1c8   :  { %615 = vsyncadd [#allocation4], 4294967168 }
 0x1c9   :  { %354 = vsyncpa [#allocation3], 1 }
 0x1ca   :  { %355 = vsyncpa [#allocation6], 1 }
 0x1cb   :  { %356 = vsyncpa [#allocation9], 1 }
 0x1cc   :  { %357 = vsyncpa [#allocation4], 1 }

</bundles_post_ra>
